<compile_context>
chip_gen: v7x
topology: tpu7x:2x2x1
jax: 0.10.0
libtpu: 0.0.40
codegen_flags: <defaults>
</compile_context>

<pallas_src>
import jax
import jax.numpy as jnp
from jax.experimental import pallas as pl
from jax.experimental.pallas import tpu as pltpu

# small shapes consistent with the module (original: N=350 nodes, T=24 steps,
# hid=32, fc=512, horizon=12)
B, N, T = 2, 16, 8          # batch, graph nodes, time steps
HID = 8                     # hid_dim
FC_HID = 128                # lane-aligned analogue of the 512-wide fc hidden layer
HORIZON = 8                 # analogue of the 12-step horizon (chosen so OUT = 128)
KSIZE, PAD = 5, 2           # temporal conv kernel / padding
NT = N * T                  # 128 -> lane axis everywhere
F = HID * NT                # Flatten() size, PyTorch (C, N, T) row-major
OUT = N * HORIZON           # 128


# ------------------------------------------------------------------ fused kernel
def _make_kernel(b_blk):
    """Kernel processing one block of `b_blk` batch elements, fully VMEM-resident."""

    def kernel(xcol_ref, t_ref, wt_ref, bt_ref, abig_ref,
               w1_ref, b1_ref, w2_ref, b2_ref,
               fc1_w_ref, fc1_b_ref, fc2_w_ref, fc2_b_ref, out_ref):
        f32 = jnp.float32

        # 0/1 replicator R[t', n*T + t] = (t == t'): tiles the (HID, T) gate across the
        # N node blocks of the lane axis with one tiny MXU matmul (no HBM gate array).
        lane_t = jax.lax.broadcasted_iota(jnp.int32, (T, NT), 1) % T
        row_t = jax.lax.broadcasted_iota(jnp.int32, (T, NT), 0)
        rep = (lane_t == row_t).astype(f32)                              # (T, N*T)

        flat_rows = []
        for b in range(b_blk):          # static unroll: tiny per-element front-end
            # temp_conv: Conv2d(1, HID, (1,5), pad=(0,2)) + ReLU as an im2col matmul
            h1 = jnp.maximum(
                jnp.dot(wt_ref[...], xcol_ref[b], preferred_element_type=f32)
                + bt_ref[...], 0.0)                                      # (HID, N*T)
            # einsum('bhnw,bhcn->bhcw', x, adj)  ==  h1 @ kron(adj.T, I_T)
            v = jnp.dot(h1, abig_ref[...], preferred_element_type=f32)   # (HID, N*T)
            # spatial_conv: the two 1x1 convs (+ ReLU) are pure channel mixes
            z1 = jnp.maximum(
                jnp.dot(w1_ref[...], v, preferred_element_type=f32) + b1_ref[...], 0.0)
            z2 = jnp.maximum(
                jnp.dot(w2_ref[...], z1, preferred_element_type=f32) + b2_ref[...], 0.0)
            # x * t.permute(0,2,1).unsqueeze(2): replicate the (HID, T) gate over N
            gate = jnp.dot(t_ref[b], rep, preferred_element_type=f32)    # (HID, N*T)
            z3 = z2 * gate                                               # (HID, N*T)
            # Flatten(): lay the HID rows side by side along lanes (every offset is a
            # multiple of 128 -> pure vreg placement) in PyTorch (h, n, t) order.
            flat_rows.append(
                jnp.concatenate([z3[h:h + 1, :] for h in range(HID)], axis=1))
        zflat = jnp.concatenate(flat_rows, axis=0)                       # (b_blk, F)

        # fc head: ONE K=F contraction (accumulation stays inside the MXU), M = b_blk.
        y1 = jnp.maximum(
            jnp.dot(zflat, fc1_w_ref[...], preferred_element_type=f32)
            + fc1_b_ref[...], 0.0)                                       # (b_blk, FC_HID)
        out_ref[0] = (jnp.dot(y1, fc2_w_ref[...], preferred_element_type=f32)
                      + fc2_b_ref[...])                                  # (b_blk, OUT)

    return kernel


def _wspec(shape):
    """BlockSpec for a grid-invariant (weight) operand: whole array every step."""
    return pl.BlockSpec(shape, lambda g: (0,) * len(shape))


def _default_batch_block(batch):
    """Whole batch per grid step on 1-TC chips (v5e/v6e); >=2 parallel steps on v7x."""
    try:
        kind = jax.devices()[0].device_kind.lower()
    except Exception:
        kind = ""
    if ("v7" in kind or "7x" in kind) and batch % 2 == 0:
        return max(1, batch // 2)
    return batch


# ---------------------------------------------------------------------- wrapper
def lite_stgcn_forward(x, t, params, b_blk=None):
    """x: (B, N, T) float32, t: (B, T, HID) float32 -> (B, N, HORIZON)."""
    if b_blk is None:
        b_blk = _default_batch_block(B)
    assert B % b_blk == 0
    n_steps = B // b_blk

    # cheap per-call layout prep: im2col for the 5-tap temporal conv, t -> (B, HID, T).
    xp = jnp.pad(x, ((0, 0), (0, 0), (PAD, PAD)))                          # (B, N, T+2P)
    xcol = jnp.stack([xp[:, :, k:k + T] for k in range(KSIZE)], axis=1)    # (B, K, N, T)
    xcol = xcol.reshape(B, KSIZE, NT)                                      # im2col
    t_hid = jnp.transpose(t, (0, 2, 1))                                    # (B, HID, T)

    y = pl.pallas_call(
        _make_kernel(b_blk),
        # batch-block axis kept leading so the last two block dims always equal the
        # full array dims (lane-dense stores, no sub-8 second-minor blocks).
        out_shape=jax.ShapeDtypeStruct((n_steps, b_blk, OUT), jnp.float32),
        grid=(n_steps,),
        in_specs=[
            pl.BlockSpec((b_blk, KSIZE, NT), lambda g: (g, 0, 0)),   # im2col input
            pl.BlockSpec((b_blk, HID, T), lambda g: (g, 0, 0)),      # gate source t
            _wspec((HID, KSIZE)),                                    # temp conv weight
            _wspec((HID, 1)),                                        # temp conv bias
            _wspec((NT, NT)),                                        # kron(adj.T, I_T)
            _wspec((2 * HID, HID)),                                  # 1x1 conv #1 weight
            _wspec((2 * HID, 1)),                                    # 1x1 conv #1 bias
            _wspec((HID, 2 * HID)),                                  # 1x1 conv #2 weight
            _wspec((HID, 1)),                                        # 1x1 conv #2 bias
            _wspec((F, FC_HID)),                                     # fc1 weight (W.T)
            _wspec((1, FC_HID)),                                     # fc1 bias
            _wspec((FC_HID, OUT)),                                   # fc2 weight (W.T)
            _wspec((1, OUT)),                                        # fc2 bias
        ],
        out_specs=pl.BlockSpec((1, b_blk, OUT), lambda g: (g, 0, 0)),
        compiler_params=pltpu.CompilerParams(
            dimension_semantics=("parallel",)),   # shards batch blocks across TCs (v7x)
    )(xcol, t_hid, params["wt"], params["bt"], params["abig"],
      params["w1"], params["b1"], params["w2"], params["b2"],
      params["fc1_wt"], params["fc1_b"], params["fc2_wt"], params["fc2_b"])
    return y.reshape(B, N, HORIZON)                              # .view(-1, 350, 12)


# ---------------------------------------------------------------- params / ref
def init_params(key):
    ks = jax.random.split(key, 11)

    def rnd(k, shape, scale=0.1):
        return jax.random.normal(k, shape, jnp.float32) * scale

    adj = jax.random.uniform(ks[0], (N, N), jnp.float32)
    adj = adj / jnp.sum(adj, axis=1, keepdims=True)          # row-normalized adjacency
    return {
        "adj": adj,
        # adjacency right-multiply matrix, built ONCE at init (params-only prep hoisted
        # out of the per-call path)
        "abig": jnp.kron(adj.T, jnp.eye(T, dtype=jnp.float32)),   # (N*T, N*T)
        "wt": rnd(ks[1], (HID, KSIZE)),        # Conv2d(1, HID, (1,5)).weight[:,0,0,:]
        "bt": rnd(ks[2], (HID, 1)),
        "w1": rnd(ks[3], (2 * HID, HID)),      # Conv2d(HID, 2*HID, 1x1).weight[:,:,0,0]
        "b1": rnd(ks[4], (2 * HID, 1)),
        "w2": rnd(ks[5], (HID, 2 * HID)),      # Conv2d(2*HID, HID, 1x1).weight[:,:,0,0]
        "b2": rnd(ks[6], (HID, 1)),
        "fc1_wt": rnd(ks[7], (F, FC_HID), 0.02),    # Linear(F, FC_HID).weight.T
        "fc1_b": rnd(ks[8], (1, FC_HID)),
        "fc2_wt": rnd(ks[9], (FC_HID, OUT), 0.02),  # Linear(FC_HID, OUT).weight.T
        "fc2_b": rnd(ks[10], (1, OUT)),
    }


def ref_forward(x, t, p):
    """Pure-JAX reference of the PyTorch forward (eval mode)."""
    xp = jnp.pad(x, ((0, 0), (0, 0), (PAD, PAD)))
    acc = jnp.zeros((B, HID, N, T), jnp.float32)
    for k in range(KSIZE):
        acc = acc + p["wt"][None, :, k, None, None] * xp[:, None, :, k:k + T]
    h1 = jax.nn.relu(acc + p["bt"][:, 0][None, :, None, None])
    h2 = jnp.einsum("cn,bhnt->bhct", p["adj"], h1)
    z1 = jax.nn.relu(jnp.einsum("oh,bhnt->bont", p["w1"], h2)
                     + p["b1"][:, 0][None, :, None, None])
    z2 = jax.nn.relu(jnp.einsum("ho,bont->bhnt", p["w2"], z1)
                     + p["b2"][:, 0][None, :, None, None])
    z3 = z2 * jnp.transpose(t, (0, 2, 1))[:, :, None, :]
    flat = z3.reshape(B, -1)
    y1 = jax.nn.relu(flat @ p["fc1_wt"] + p["fc1_b"])
    y2 = y1 @ p["fc2_wt"] + p["fc2_b"]
    return y2.reshape(B, N, HORIZON)


if __name__ == "__main__":
    key = jax.random.PRNGKey(0)
    kx, kt, kp = jax.random.split(key, 3)
    x = jax.random.normal(kx, (B, N, T), jnp.float32)          # (batch, nodes, time)
    t_feat = jax.random.normal(kt, (B, T, HID), jnp.float32)   # temporal embedding t
    params = init_params(kp)

    fwd = jax.jit(lite_stgcn_forward)
    out = jax.block_until_ready(fwd(x, t_feat, params))

    ref = ref_forward(x, t_feat, params)
    assert out.shape == (B, N, HORIZON), out.shape
    # tolerance accounts for default-precision (bf16-operand) MXU matmuls in the kernel
    # vs. the exact elementwise f32 temporal conv in the reference
    assert jnp.allclose(out, ref, atol=5e-3, rtol=5e-3), float(jnp.max(jnp.abs(out - ref)))
    print("KERNEL_OK")
</pallas_src>

<mosaic_0001>
module attributes {stable_mosaic.version = 11 : i64} {
  func.func @kernel(%arg0: i32, %arg1: memref<2x5x128xf32, #tpu.memory_space<vmem>>, %arg2: memref<2x8x8xf32, #tpu.memory_space<vmem>>, %arg3: memref<8x5xf32, #tpu.memory_space<vmem>>, %arg4: memref<8x1xf32, #tpu.memory_space<vmem>>, %arg5: memref<128x128xf32, #tpu.memory_space<vmem>>, %arg6: memref<16x8xf32, #tpu.memory_space<vmem>>, %arg7: memref<16x1xf32, #tpu.memory_space<vmem>>, %arg8: memref<8x16xf32, #tpu.memory_space<vmem>>, %arg9: memref<8x1xf32, #tpu.memory_space<vmem>>, %arg10: memref<1024x128xf32, #tpu.memory_space<vmem>>, %arg11: memref<1x128xf32, #tpu.memory_space<vmem>>, %arg12: memref<128x128xf32, #tpu.memory_space<vmem>>, %arg13: memref<1x128xf32, #tpu.memory_space<vmem>>, %arg14: memref<1x2x128xf32, #tpu.memory_space<vmem>>) attributes {dimension_semantics = [#tpu.dimension_semantics<parallel>], iteration_bounds = array<i64: 1>, scalar_prefetch = 0 : i64, scratch_operands = 0 : i64, tpu.core_type = #tpu.core_type<tc>, window_params = [{transform_indices = @transform_0, window_bounds = array<i64: 2, 5, 128>}, {transform_indices = @transform_1, window_bounds = array<i64: 2, 8, 8>}, {pipeline_mode = #tpu.pipeline_mode<synchronous>, transform_indices = @transform_2, window_bounds = array<i64: 8, 5>}, {pipeline_mode = #tpu.pipeline_mode<synchronous>, transform_indices = @transform_3, window_bounds = array<i64: 8, 1>}, {pipeline_mode = #tpu.pipeline_mode<synchronous>, transform_indices = @transform_4, window_bounds = array<i64: 128, 128>}, {pipeline_mode = #tpu.pipeline_mode<synchronous>, transform_indices = @transform_5, window_bounds = array<i64: 16, 8>}, {pipeline_mode = #tpu.pipeline_mode<synchronous>, transform_indices = @transform_6, window_bounds = array<i64: 16, 1>}, {pipeline_mode = #tpu.pipeline_mode<synchronous>, transform_indices = @transform_7, window_bounds = array<i64: 8, 16>}, {pipeline_mode = #tpu.pipeline_mode<synchronous>, transform_indices = @transform_8, window_bounds = array<i64: 8, 1>}, {pipeline_mode = #tpu.pipeline_mode<synchronous>, transform_indices = @transform_9, window_bounds = array<i64: 1024, 128>}, {pipeline_mode = #tpu.pipeline_mode<synchronous>, transform_indices = @transform_10, window_bounds = array<i64: 1, 128>}, {pipeline_mode = #tpu.pipeline_mode<synchronous>, transform_indices = @transform_11, window_bounds = array<i64: 128, 128>}, {pipeline_mode = #tpu.pipeline_mode<synchronous>, transform_indices = @transform_12, window_bounds = array<i64: 1, 128>}, {transform_indices = @transform_13, window_bounds = array<i64: 1, 2, 128>}]} {
    %0 = tpu.iota {dimensions = array<i32: 1>} : vector<8x128xi32>
    %c8_i32 = arith.constant 8 : i32
    %c0_i32 = arith.constant 0 : i32
    %1 = arith.cmpi eq, %c8_i32, %c0_i32 : i32
    %c1_i32 = arith.constant 1 : i32
    %2 = arith.select %1, %c1_i32, %c8_i32 : i32
    %3 = vector.broadcast %2 : i32 to vector<8x128xi32>
    %4 = arith.remsi %0, %3 : vector<8x128xi32>
    %c0_i32_0 = arith.constant 0 : i32
    %5 = vector.broadcast %c0_i32_0 : i32 to vector<8x128xi32>
    %6 = arith.cmpi ne, %4, %5 : vector<8x128xi32>
    %c0_i32_1 = arith.constant 0 : i32
    %7 = vector.broadcast %c0_i32_1 : i32 to vector<8x128xi32>
    %8 = arith.cmpi slt, %4, %7 : vector<8x128xi32>
    %c0_i32_2 = arith.constant 0 : i32
    %9 = arith.cmpi slt, %2, %c0_i32_2 : i32
    %10 = vector.broadcast %9 : i1 to vector<8x128xi1>
    %11 = vector.broadcast %10 : vector<8x128xi1> to vector<8x128xi1>
    %12 = arith.xori %8, %11 : vector<8x128xi1>
    %13 = arith.andi %12, %6 : vector<8x128xi1>
    %14 = vector.broadcast %2 : i32 to vector<8x128xi32>
    %15 = arith.addi %4, %14 : vector<8x128xi32>
    %16 = arith.select %13, %15, %4 : vector<8x128xi1>, vector<8x128xi32>
    %17 = tpu.iota {dimensions = array<i32: 0>} : vector<8x128xi32>
    %18 = arith.cmpi eq, %16, %17 : vector<8x128xi32>
    %19 = arith.extui %18 : vector<8x128xi1> to vector<8x128xi32>
    %20 = arith.sitofp %19 : vector<8x128xi32> to vector<8x128xf32>
    %c0 = arith.constant 0 : index
    %c0_3 = arith.constant 0 : index
    %21 = vector.load %arg3[%c0, %c0_3] : memref<8x5xf32, #tpu.memory_space<vmem>>, vector<8x5xf32>
    %c0_4 = arith.constant 0 : index
    %c0_5 = arith.constant 0 : index
    %c0_6 = arith.constant 0 : index
    %22 = vector.load %arg1[%c0_4, %c0_5, %c0_6] : memref<2x5x128xf32, #tpu.memory_space<vmem>>, vector<1x5x128xf32>
    %23 = vector.shape_cast %22 : vector<1x5x128xf32> to vector<5x128xf32>
    %cst = arith.constant dense<0.000000e+00> : vector<8x128xf32>
    %24 = tpu.matmul %21, %23, %cst {dimension_numbers = #tpu.dot_dimension_numbers<[1], [0], [0], [1], [0, 0, 1, 1], [], []>} : vector<8x5xf32>, vector<5x128xf32>, vector<8x128xf32> -> vector<8x128xf32>
    %c0_7 = arith.constant 0 : index
    %c0_8 = arith.constant 0 : index
    %25 = vector.load %arg4[%c0_7, %c0_8] : memref<8x1xf32, #tpu.memory_space<vmem>>, vector<8x1xf32>
    %26 = vector.broadcast %25 : vector<8x1xf32> to vector<8x128xf32>
    %27 = arith.addf %24, %26 : vector<8x128xf32>
    %cst_9 = arith.constant 0.000000e+00 : f32
    %28 = vector.broadcast %cst_9 : f32 to vector<8x128xf32>
    %29 = arith.maximumf %27, %28 : vector<8x128xf32>
    %c0_10 = arith.constant 0 : index
    %c0_11 = arith.constant 0 : index
    %30 = vector.load %arg5[%c0_10, %c0_11] : memref<128x128xf32, #tpu.memory_space<vmem>>, vector<128x128xf32>
    %cst_12 = arith.constant dense<0.000000e+00> : vector<8x128xf32>
    %31 = tpu.matmul %29, %30, %cst_12 {dimension_numbers = #tpu.dot_dimension_numbers<[1], [0], [0], [1], [0, 0, 1, 1], [], []>} : vector<8x128xf32>, vector<128x128xf32>, vector<8x128xf32> -> vector<8x128xf32>
    %c0_13 = arith.constant 0 : index
    %c0_14 = arith.constant 0 : index
    %32 = vector.load %arg6[%c0_13, %c0_14] : memref<16x8xf32, #tpu.memory_space<vmem>>, vector<16x8xf32>
    %cst_15 = arith.constant dense<0.000000e+00> : vector<16x128xf32>
    %33 = tpu.matmul %32, %31, %cst_15 {dimension_numbers = #tpu.dot_dimension_numbers<[1], [0], [0], [1], [0, 0, 1, 1], [], []>} : vector<16x8xf32>, vector<8x128xf32>, vector<16x128xf32> -> vector<16x128xf32>
    %c0_16 = arith.constant 0 : index
    %c0_17 = arith.constant 0 : index
    %34 = vector.load %arg7[%c0_16, %c0_17] : memref<16x1xf32, #tpu.memory_space<vmem>>, vector<16x1xf32>
    %35 = vector.broadcast %34 : vector<16x1xf32> to vector<16x128xf32>
    %36 = arith.addf %33, %35 : vector<16x128xf32>
    %cst_18 = arith.constant 0.000000e+00 : f32
    %37 = vector.broadcast %cst_18 : f32 to vector<16x128xf32>
    %38 = arith.maximumf %36, %37 : vector<16x128xf32>
    %c0_19 = arith.constant 0 : index
    %c0_20 = arith.constant 0 : index
    %39 = vector.load %arg8[%c0_19, %c0_20] : memref<8x16xf32, #tpu.memory_space<vmem>>, vector<8x16xf32>
    %cst_21 = arith.constant dense<0.000000e+00> : vector<8x128xf32>
    %40 = tpu.matmul %39, %38, %cst_21 {dimension_numbers = #tpu.dot_dimension_numbers<[1], [0], [0], [1], [0, 0, 1, 1], [], []>} : vector<8x16xf32>, vector<16x128xf32>, vector<8x128xf32> -> vector<8x128xf32>
    %c0_22 = arith.constant 0 : index
    %c0_23 = arith.constant 0 : index
    %41 = vector.load %arg9[%c0_22, %c0_23] : memref<8x1xf32, #tpu.memory_space<vmem>>, vector<8x1xf32>
    %42 = vector.broadcast %41 : vector<8x1xf32> to vector<8x128xf32>
    %43 = arith.addf %40, %42 : vector<8x128xf32>
    %cst_24 = arith.constant 0.000000e+00 : f32
    %44 = vector.broadcast %cst_24 : f32 to vector<8x128xf32>
    %45 = arith.maximumf %43, %44 : vector<8x128xf32>
    %c0_25 = arith.constant 0 : index
    %c0_26 = arith.constant 0 : index
    %c0_27 = arith.constant 0 : index
    %46 = vector.load %arg2[%c0_25, %c0_26, %c0_27] : memref<2x8x8xf32, #tpu.memory_space<vmem>>, vector<1x8x8xf32>
    %47 = vector.shape_cast %46 : vector<1x8x8xf32> to vector<8x8xf32>
    %cst_28 = arith.constant dense<0.000000e+00> : vector<8x128xf32>
    %48 = tpu.matmul %47, %20, %cst_28 {dimension_numbers = #tpu.dot_dimension_numbers<[1], [0], [0], [1], [0, 0, 1, 1], [], []>} : vector<8x8xf32>, vector<8x128xf32>, vector<8x128xf32> -> vector<8x128xf32>
    %49 = arith.mulf %45, %48 : vector<8x128xf32>
    %50 = vector.extract_strided_slice %49 {offsets = [0, 0], sizes = [1, 128], strides = [1, 1]} : vector<8x128xf32> to vector<1x128xf32>
    %51 = vector.extract_strided_slice %49 {offsets = [1, 0], sizes = [1, 128], strides = [1, 1]} : vector<8x128xf32> to vector<1x128xf32>
    %52 = vector.extract_strided_slice %49 {offsets = [2, 0], sizes = [1, 128], strides = [1, 1]} : vector<8x128xf32> to vector<1x128xf32>
    %53 = vector.extract_strided_slice %49 {offsets = [3, 0], sizes = [1, 128], strides = [1, 1]} : vector<8x128xf32> to vector<1x128xf32>
    %54 = vector.extract_strided_slice %49 {offsets = [4, 0], sizes = [1, 128], strides = [1, 1]} : vector<8x128xf32> to vector<1x128xf32>
    %55 = vector.extract_strided_slice %49 {offsets = [5, 0], sizes = [1, 128], strides = [1, 1]} : vector<8x128xf32> to vector<1x128xf32>
    %56 = vector.extract_strided_slice %49 {offsets = [6, 0], sizes = [1, 128], strides = [1, 1]} : vector<8x128xf32> to vector<1x128xf32>
    %57 = vector.extract_strided_slice %49 {offsets = [7, 0], sizes = [1, 128], strides = [1, 1]} : vector<8x128xf32> to vector<1x128xf32>
    %58 = tpu.concatenate %50, %51, %52, %53, %54, %55, %56, %57 in 1 : vector<1x128xf32>, vector<1x128xf32>, vector<1x128xf32>, vector<1x128xf32>, vector<1x128xf32>, vector<1x128xf32>, vector<1x128xf32>, vector<1x128xf32> -> vector<1x1024xf32>
    %c0_29 = arith.constant 0 : index
    %c0_30 = arith.constant 0 : index
    %59 = vector.load %arg3[%c0_29, %c0_30] : memref<8x5xf32, #tpu.memory_space<vmem>>, vector<8x5xf32>
    %c1 = arith.constant 1 : index
    %c0_31 = arith.constant 0 : index
    %c0_32 = arith.constant 0 : index
    %60 = vector.load %arg1[%c1, %c0_31, %c0_32] : memref<2x5x128xf32, #tpu.memory_space<vmem>>, vector<1x5x128xf32>
    %61 = vector.shape_cast %60 : vector<1x5x128xf32> to vector<5x128xf32>
    %cst_33 = arith.constant dense<0.000000e+00> : vector<8x128xf32>
    %62 = tpu.matmul %59, %61, %cst_33 {dimension_numbers = #tpu.dot_dimension_numbers<[1], [0], [0], [1], [0, 0, 1, 1], [], []>} : vector<8x5xf32>, vector<5x128xf32>, vector<8x128xf32> -> vector<8x128xf32>
    %c0_34 = arith.constant 0 : index
    %c0_35 = arith.constant 0 : index
    %63 = vector.load %arg4[%c0_34, %c0_35] : memref<8x1xf32, #tpu.memory_space<vmem>>, vector<8x1xf32>
    %64 = vector.broadcast %63 : vector<8x1xf32> to vector<8x128xf32>
    %65 = arith.addf %62, %64 : vector<8x128xf32>
    %cst_36 = arith.constant 0.000000e+00 : f32
    %66 = vector.broadcast %cst_36 : f32 to vector<8x128xf32>
    %67 = arith.maximumf %65, %66 : vector<8x128xf32>
    %c0_37 = arith.constant 0 : index
    %c0_38 = arith.constant 0 : index
    %68 = vector.load %arg5[%c0_37, %c0_38] : memref<128x128xf32, #tpu.memory_space<vmem>>, vector<128x128xf32>
    %cst_39 = arith.constant dense<0.000000e+00> : vector<8x128xf32>
    %69 = tpu.matmul %67, %68, %cst_39 {dimension_numbers = #tpu.dot_dimension_numbers<[1], [0], [0], [1], [0, 0, 1, 1], [], []>} : vector<8x128xf32>, vector<128x128xf32>, vector<8x128xf32> -> vector<8x128xf32>
    %c0_40 = arith.constant 0 : index
    %c0_41 = arith.constant 0 : index
    %70 = vector.load %arg6[%c0_40, %c0_41] : memref<16x8xf32, #tpu.memory_space<vmem>>, vector<16x8xf32>
    %cst_42 = arith.constant dense<0.000000e+00> : vector<16x128xf32>
    %71 = tpu.matmul %70, %69, %cst_42 {dimension_numbers = #tpu.dot_dimension_numbers<[1], [0], [0], [1], [0, 0, 1, 1], [], []>} : vector<16x8xf32>, vector<8x128xf32>, vector<16x128xf32> -> vector<16x128xf32>
    %c0_43 = arith.constant 0 : index
    %c0_44 = arith.constant 0 : index
    %72 = vector.load %arg7[%c0_43, %c0_44] : memref<16x1xf32, #tpu.memory_space<vmem>>, vector<16x1xf32>
    %73 = vector.broadcast %72 : vector<16x1xf32> to vector<16x128xf32>
    %74 = arith.addf %71, %73 : vector<16x128xf32>
    %cst_45 = arith.constant 0.000000e+00 : f32
    %75 = vector.broadcast %cst_45 : f32 to vector<16x128xf32>
    %76 = arith.maximumf %74, %75 : vector<16x128xf32>
    %c0_46 = arith.constant 0 : index
    %c0_47 = arith.constant 0 : index
    %77 = vector.load %arg8[%c0_46, %c0_47] : memref<8x16xf32, #tpu.memory_space<vmem>>, vector<8x16xf32>
    %cst_48 = arith.constant dense<0.000000e+00> : vector<8x128xf32>
    %78 = tpu.matmul %77, %76, %cst_48 {dimension_numbers = #tpu.dot_dimension_numbers<[1], [0], [0], [1], [0, 0, 1, 1], [], []>} : vector<8x16xf32>, vector<16x128xf32>, vector<8x128xf32> -> vector<8x128xf32>
    %c0_49 = arith.constant 0 : index
    %c0_50 = arith.constant 0 : index
    %79 = vector.load %arg9[%c0_49, %c0_50] : memref<8x1xf32, #tpu.memory_space<vmem>>, vector<8x1xf32>
    %80 = vector.broadcast %79 : vector<8x1xf32> to vector<8x128xf32>
    %81 = arith.addf %78, %80 : vector<8x128xf32>
    %cst_51 = arith.constant 0.000000e+00 : f32
    %82 = vector.broadcast %cst_51 : f32 to vector<8x128xf32>
    %83 = arith.maximumf %81, %82 : vector<8x128xf32>
    %c1_52 = arith.constant 1 : index
    %c0_53 = arith.constant 0 : index
    %c0_54 = arith.constant 0 : index
    %84 = vector.load %arg2[%c1_52, %c0_53, %c0_54] : memref<2x8x8xf32, #tpu.memory_space<vmem>>, vector<1x8x8xf32>
    %85 = vector.shape_cast %84 : vector<1x8x8xf32> to vector<8x8xf32>
    %cst_55 = arith.constant dense<0.000000e+00> : vector<8x128xf32>
    %86 = tpu.matmul %85, %20, %cst_55 {dimension_numbers = #tpu.dot_dimension_numbers<[1], [0], [0], [1], [0, 0, 1, 1], [], []>} : vector<8x8xf32>, vector<8x128xf32>, vector<8x128xf32> -> vector<8x128xf32>
    %87 = arith.mulf %83, %86 : vector<8x128xf32>
    %88 = vector.extract_strided_slice %87 {offsets = [0, 0], sizes = [1, 128], strides = [1, 1]} : vector<8x128xf32> to vector<1x128xf32>
    %89 = vector.extract_strided_slice %87 {offsets = [1, 0], sizes = [1, 128], strides = [1, 1]} : vector<8x128xf32> to vector<1x128xf32>
    %90 = vector.extract_strided_slice %87 {offsets = [2, 0], sizes = [1, 128], strides = [1, 1]} : vector<8x128xf32> to vector<1x128xf32>
    %91 = vector.extract_strided_slice %87 {offsets = [3, 0], sizes = [1, 128], strides = [1, 1]} : vector<8x128xf32> to vector<1x128xf32>
    %92 = vector.extract_strided_slice %87 {offsets = [4, 0], sizes = [1, 128], strides = [1, 1]} : vector<8x128xf32> to vector<1x128xf32>
    %93 = vector.extract_strided_slice %87 {offsets = [5, 0], sizes = [1, 128], strides = [1, 1]} : vector<8x128xf32> to vector<1x128xf32>
    %94 = vector.extract_strided_slice %87 {offsets = [6, 0], sizes = [1, 128], strides = [1, 1]} : vector<8x128xf32> to vector<1x128xf32>
    %95 = vector.extract_strided_slice %87 {offsets = [7, 0], sizes = [1, 128], strides = [1, 1]} : vector<8x128xf32> to vector<1x128xf32>
    %96 = tpu.concatenate %88, %89, %90, %91, %92, %93, %94, %95 in 1 : vector<1x128xf32>, vector<1x128xf32>, vector<1x128xf32>, vector<1x128xf32>, vector<1x128xf32>, vector<1x128xf32>, vector<1x128xf32>, vector<1x128xf32> -> vector<1x1024xf32>
    %97 = tpu.concatenate %58, %96 in 0 : vector<1x1024xf32>, vector<1x1024xf32> -> vector<2x1024xf32>
    %c0_56 = arith.constant 0 : index
    %c0_57 = arith.constant 0 : index
    %98 = vector.load %arg10[%c0_56, %c0_57] : memref<1024x128xf32, #tpu.memory_space<vmem>>, vector<1024x128xf32>
    %cst_58 = arith.constant dense<0.000000e+00> : vector<2x128xf32>
    %99 = tpu.matmul %97, %98, %cst_58 {dimension_numbers = #tpu.dot_dimension_numbers<[1], [0], [0], [1], [0, 0, 1, 1], [], []>} : vector<2x1024xf32>, vector<1024x128xf32>, vector<2x128xf32> -> vector<2x128xf32>
    %c0_59 = arith.constant 0 : index
    %c0_60 = arith.constant 0 : index
    %100 = vector.load %arg11[%c0_59, %c0_60] : memref<1x128xf32, #tpu.memory_space<vmem>>, vector<1x128xf32>
    %101 = vector.broadcast %100 : vector<1x128xf32> to vector<2x128xf32>
    %102 = arith.addf %99, %101 : vector<2x128xf32>
    %cst_61 = arith.constant 0.000000e+00 : f32
    %103 = vector.broadcast %cst_61 : f32 to vector<2x128xf32>
    %104 = arith.maximumf %102, %103 : vector<2x128xf32>
    %c0_62 = arith.constant 0 : index
    %c0_63 = arith.constant 0 : index
    %105 = vector.load %arg12[%c0_62, %c0_63] : memref<128x128xf32, #tpu.memory_space<vmem>>, vector<128x128xf32>
    %cst_64 = arith.constant dense<0.000000e+00> : vector<2x128xf32>
    %106 = tpu.matmul %104, %105, %cst_64 {dimension_numbers = #tpu.dot_dimension_numbers<[1], [0], [0], [1], [0, 0, 1, 1], [], []>} : vector<2x128xf32>, vector<128x128xf32>, vector<2x128xf32> -> vector<2x128xf32>
    %c0_65 = arith.constant 0 : index
    %c0_66 = arith.constant 0 : index
    %107 = vector.load %arg13[%c0_65, %c0_66] : memref<1x128xf32, #tpu.memory_space<vmem>>, vector<1x128xf32>
    %108 = vector.broadcast %107 : vector<1x128xf32> to vector<2x128xf32>
    %109 = arith.addf %106, %108 : vector<2x128xf32>
    %c0_67 = arith.constant 0 : index
    %c0_68 = arith.constant 0 : index
    %c0_69 = arith.constant 0 : index
    %110 = vector.load %arg14[%c0_67, %c0_68, %c0_69] : memref<1x2x128xf32, #tpu.memory_space<vmem>>, vector<1x2x128xf32>
    %111 = vector.shape_cast %110 : vector<1x2x128xf32> to vector<2x128xf32>
    %112 = vector.shape_cast %109 : vector<2x128xf32> to vector<1x2x128xf32>
    tpu.vector_store %arg14[%c0_67, %c0_68, %c0_69], %112 {strides = array<i32>} : memref<1x2x128xf32, #tpu.memory_space<vmem>>, vector<1x2x128xf32>,
    return
  }
  func.func @transform_0(%arg0: i32) -> (i32, i32, i32) {
    %c0_i32 = arith.constant 0 : i32
    %c0_i32_0 = arith.constant 0 : i32
    %c0_i32_1 = arith.constant 0 : i32
    return %arg0, %c0_i32, %c0_i32_0 : i32, i32, i32
  }
  func.func @transform_1(%arg0: i32) -> (i32, i32, i32) {
    %c0_i32 = arith.constant 0 : i32
    %c0_i32_0 = arith.constant 0 : i32
    %c0_i32_1 = arith.constant 0 : i32
    return %arg0, %c0_i32, %c0_i32_0 : i32, i32, i32
  }
  func.func @transform_2(%arg0: i32) -> (i32, i32) {
    %c0_i32 = arith.constant 0 : i32
    %c0_i32_0 = arith.constant 0 : i32
    %c0_i32_1 = arith.constant 0 : i32
    return %c0_i32, %c0_i32_0 : i32, i32
  }
  func.func @transform_3(%arg0: i32) -> (i32, i32) {
    %c0_i32 = arith.constant 0 : i32
    %c0_i32_0 = arith.constant 0 : i32
    %c0_i32_1 = arith.constant 0 : i32
    return %c0_i32, %c0_i32_0 : i32, i32
  }
  func.func @transform_4(%arg0: i32) -> (i32, i32) {
    %c0_i32 = arith.constant 0 : i32
    %c0_i32_0 = arith.constant 0 : i32
    %c0_i32_1 = arith.constant 0 : i32
    return %c0_i32, %c0_i32_0 : i32, i32
  }
  func.func @transform_5(%arg0: i32) -> (i32, i32) {
    %c0_i32 = arith.constant 0 : i32
    %c0_i32_0 = arith.constant 0 : i32
    %c0_i32_1 = arith.constant 0 : i32
    return %c0_i32, %c0_i32_0 : i32, i32
  }
  func.func @transform_6(%arg0: i32) -> (i32, i32) {
    %c0_i32 = arith.constant 0 : i32
    %c0_i32_0 = arith.constant 0 : i32
    %c0_i32_1 = arith.constant 0 : i32
    return %c0_i32, %c0_i32_0 : i32, i32
  }
  func.func @transform_7(%arg0: i32) -> (i32, i32) {
    %c0_i32 = arith.constant 0 : i32
    %c0_i32_0 = arith.constant 0 : i32
    %c0_i32_1 = arith.constant 0 : i32
    return %c0_i32, %c0_i32_0 : i32, i32
  }
  func.func @transform_8(%arg0: i32) -> (i32, i32) {
    %c0_i32 = arith.constant 0 : i32
    %c0_i32_0 = arith.constant 0 : i32
    %c0_i32_1 = arith.constant 0 : i32
    return %c0_i32, %c0_i32_0 : i32, i32
  }
  func.func @transform_9(%arg0: i32) -> (i32, i32) {
    %c0_i32 = arith.constant 0 : i32
    %c0_i32_0 = arith.constant 0 : i32
    %c0_i32_1 = arith.constant 0 : i32
    return %c0_i32, %c0_i32_0 : i32, i32
  }
  func.func @transform_10(%arg0: i32) -> (i32, i32) {
    %c0_i32 = arith.constant 0 : i32
    %c0_i32_0 = arith.constant 0 : i32
    %c0_i32_1 = arith.constant 0 : i32
    return %c0_i32, %c0_i32_0 : i32, i32
  }
  func.func @transform_11(%arg0: i32) -> (i32, i32) {
    %c0_i32 = arith.constant 0 : i32
    %c0_i32_0 = arith.constant 0 : i32
    %c0_i32_1 = arith.constant 0 : i32
    return %c0_i32, %c0_i32_0 : i32, i32
  }
  func.func @transform_12(%arg0: i32) -> (i32, i32) {
    %c0_i32 = arith.constant 0 : i32
    %c0_i32_0 = arith.constant 0 : i32
    %c0_i32_1 = arith.constant 0 : i32
    return %c0_i32, %c0_i32_0 : i32, i32
  }
  func.func @transform_13(%arg0: i32) -> (i32, i32, i32) {
    %c0_i32 = arith.constant 0 : i32
    %c0_i32_0 = arith.constant 0 : i32
    %c0_i32_1 = arith.constant 0 : i32
    return %arg0, %c0_i32, %c0_i32_0 : i32, i32, i32
  }
}

</mosaic_0001>

<bundles_post_ra>
// kernel: lite_stgcn_forward.1
= control target key start
LH: loop header
LB: loop body
LE: loop exit
PB: predicated region body
PF: predicated region fallthrough
CT: control target
= control target key end

     0   :  { %18 = vsyncpa [#allocation3], 0  ;;  %s2062_s25 = smov [#allocation2]   ;;  %s2451_s0 = inlined_call_operand.vmem [shape: f32[2,5,128], index: 0, kind: input, shape index: {}]   ;;  %s2452_s1 = inlined_call_operand.vmem [shape: f32[2,8,8], index: 1, kind: input, shape index: {}]   ;;  %s2453_s2 = inlined_call_operand.vmem [shape: f32[8,5], index: 2, kind: input, shape index: {}]   ;;  %s2454_s3 = inlined_call_operand.vmem [shape: f32[8,1], index: 3, kind: input, shape index: {}]   ;;  %s2455_s4 = inlined_call_operand.vmem [shape: f32[128,128], index: 4, kind: input, shape index: {}]   ;;  %s2456_s5 = inlined_call_operand.vmem [shape: f32[16,8], index: 5, kind: input, shape index: {}]   ;;  %s2457_s6 = inlined_call_operand.vmem [shape: f32[16,1], index: 6, kind: input, shape index: {}]   ;;  %s2458_s7 = inlined_call_operand.vmem [shape: f32[8,16], index: 7, kind: input, shape index: {}]   ;;  %s2459_s8 = inlined_call_operand.vmem [shape: f32[8,1], index: 8, kind: input, shape index: {}]   ;;  %s2460_s9 = inlined_call_operand.hbm [shape: f32[1024,128], index: 9, kind: input, shape index: {}]   ;;  %s2461_s10 = inlined_call_operand.vmem [shape: f32[1,128], index: 10, kind: input, shape index: {}]   ;;  %s2462_s11 = inlined_call_operand.vmem [shape: f32[128,128], index: 11, kind: input, shape index: {}]   ;;  %s2463_s12 = inlined_call_operand.vmem [shape: f32[1,128], index: 12, kind: input, shape index: {}]   ;;  %s2464_s13 = inlined_call_operand.vmem [shape: f32[1,2,128], index: 13, kind: output, shape index: {}]  }
   0x1   :  { %s42_s26 = sshll.u32 %s2062_s25, 4  ;;  %s2038_s29 = scalar_lea.hbm %s2460_s9, 16384  ;;  %s43_s26 = int_to_ptr.vmem [resolvable:$true] %s42_s26 }
   0x2   :  { %p2039_p0 = scmp.ne.s32.totalorder %s2460_s9, %s2038_s29  ;;  %p2042_p1 = scmp.lt.u32.totalorder %s2038_s29, %s2460_s9 }
   0x4   :  { %p2044_p2 = pnand %p2042_p1, %p2039_p0 }
   0x6   :  { %2047 = shalt.err (!%p2044_p2)
}
   0x7   :  { %s2048_s17 = scalar_lea.vmem %s43_s26, 16384  ;;  %p2053_p4 = scmp.lt.s32.totalorder %s43_s26, %s43_s26 }
   0x8   :  { %p2049_p3 = scmp.ne.s32.totalorder %s43_s26, %s2048_s17  ;;  %p2054_p5 = scmp.lt.s32.totalorder %s2048_s17, %s2048_s17 }
   0xa   :  { %p2055_p6 = por %p2054_p5, %p2053_p4 }
   0xc   :  { %p2056_p7 = pnand %p2055_p6, %p2049_p3 }
   0xe   :  { %2059 = shalt.err (!%p2056_p7)
}
   0xf   :  { %s2063_s18 = smov 128   ;;  %s2064_s19 = smov 8  }
  0x10   :  { %48 = dma.hbm_to_vmem [thread:$0]  %s2460_s9, 16384, %s43_s26, [#allocation3], %s2063_s18, %s2063_s18, %s2064_s19  }
  0x11   :  { %2060 = dma.done.wait [#allocation3], 16384  }
  0x12   :  { %2061 = vsyncadd [#allocation3], 4294950912  ;;  %v2065_v0 = vmov 0.0   ;;  %vm2066_vm0 = vmmov 0   ;;  %v2067_v1 = vmov 0   ;;  %v2068_v2 = vmov 0.0|0.0  }
  0x13   :  { %1673 = vmatprep.subr.mxu0 %v2065_v0  ;;  %1675 = vmatprep.mubr.msk.f32.mxu0 %vm2066_vm0, %v2065_v0  ;;  %vm89_vm1 = vcmask 1044480   ;;  %vm85_vm2 = vcmask 39936   ;;  %v78_v3 = vld [vmem:[%s2451_s0] sm:$0x1f]  ;;  %v165_v7 = vld [vmem:[%s2455_s4 + $0x8] sm:$0xff]  ;;  %v166_v10 = vld [vmem:[%s2455_s4 + $0x10] sm:$0xff]  ;;  %v58_v42 = vlaneseq }
  0x14   :  { %2036 = vset.pattern.permute.xlu0 %v2067_v1  ;;  %1822 = vmatprep.subr.bf16.mxu1 %v2068_v2  ;;  %v2164_v4 = vld [vmem:[%s2453_s2] sm:$0xff]  ;;  %v167_v11 = vld [vmem:[%s2455_s4 + $0x18] sm:$0xff]  ;;  %v169_v14 = vld [vmem:[%s2455_s4 + $0x28] sm:$0xff]  ;;  %vm264_vm3 = vcmask 64512   ;;  %vm355_vm4 = vcmask 130048   ;;  %v2069_v57 = vmov 1.0  }
  0x15   :  { %1710 = vmatprep.mubr.msk.f32.mxu1 %vm2066_vm0, %v2065_v0  ;;  %2037 = vset.pattern.permute.xlu1 %v2067_v1  ;;  %v79_v5 = vld [vmem:[%s2454_s3] sm:$0xff]  ;;  %v2190_v12 = vpack.c.bf16 %v167_v11, %v166_v10  ;;  %v170_v16 = vld [vmem:[%s2455_s4 + $0x30] sm:$0xff]  ;;  %v171_v17 = vld [vmem:[%s2455_s4 + $0x38] sm:$0xff]  ;;  %v59_v48 = vand.u32 127, %v58_v42  ;;  %v73_v53 = vshrl.u32 %v58_v42, 7  ;;  %vm913_vm6 = vcmask 1040384  }
  0x16   :  { %1674 = vmatpush3.msk.msra.mxu0 %vm89_vm1, %v78_v3  ;;  %82 = vperm.xlu0 %2036, %v79_v5   ;;  %v164_v6 = vld [vmem:[%s2455_s4] sm:$0xff]  ;;  %v2210_v18 = vpack.c.bf16 %v171_v17, %v170_v16  ;;  %v173_v20 = vld [vmem:[%s2455_s4 + $0x48] sm:$0xff]  ;;  %v174_v22 = vld [vmem:[%s2455_s4 + $0x50] sm:$0xff] }
  0x17   :  { %1676 = vmatmul.mubr.msk.f32.vlgmr.msra.gmra.mrb[0].mxu0 %vm85_vm2, %v2164_v4  ;;  %v252_v8 = vld [vmem:[%s2457_s6] sm:$0xff]  ;;  %v2181_v9 = vpack.c.bf16 %v165_v7, %v164_v6  ;;  %v175_v23 = vld [vmem:[%s2455_s4 + $0x58] sm:$0xff]  ;;  %v177_v26 = vld [vmem:[%s2455_s4 + $0x68] sm:$0xff]  ;;  %v64_v52 = vand.u32 7, %v59_v48 }
  0x18   :  { %v168_v13 = vld [vmem:[%s2455_s4 + $0x20] sm:$0xff]  ;;  %v2230_v24 = vpack.c.bf16 %v175_v23, %v174_v22  ;;  %v178_v28 = vld [vmem:[%s2455_s4 + $0x70] sm:$0xff]  ;;  %v179_v29 = vld [vmem:[%s2455_s4 + $0x78] sm:$0xff] }
  0x19   :  { %1824 = vmatpush3.bf16.msra.mxu1 %v2181_v9  ;;  %v2200_v15 = vpack.c.bf16 %v169_v14, %v168_v13  ;;  %v172_v19 = vld [vmem:[%s2455_s4 + $0x40] sm:$0xff]  ;;  %v2251_v30 = vpack.c.bf16 %v179_v29, %v178_v28  ;;  %v253_v37 = vld [vmem:[%s2457_s6 + $0x8] sm:$0xff]  ;;  %vm2292_vm5 = vcmp.eq.s32.totalorder %v64_v52, %v73_v53  ;;  %v948_v42 = vld [vmem:[#allocation2 + $0xd0] sm:$0xff] }
  0x1a   :  { %256 = vperm.xlu0 %2036, %v252_v8   ;;  %1825 = vmatprep.subr.bf16.mxu1 %v2068_v2  ;;  %v2220_v21 = vpack.c.bf16 %v173_v20, %v172_v19  ;;  %v176_v25 = vld [vmem:[%s2455_s4 + $0x60] sm:$0xff]  ;;  %v2273_v40 = vld [vmem:[%s2456_s5 + $0x8] sm:$0xff]  ;;  %v941_v19 = vld [vmem:[#allocation2 + $0x98] sm:$0xff] }
  0x1b   :  { %v2240_v27 = vpack.c.bf16 %v177_v26, %v176_v25  ;;  %v2260_v36 = vld [vmem:[%s2456_s5] sm:$0xff]  ;;  %261 = vperm.xlu1 %2037, %v253_v37   ;;  %v1445_v59 = vld [vmem:[%s2451_s0 + $0x8] sm:$0x1f]  ;;  %v924_v20 = vld [vmem:[#allocation2 + $0x10] sm:$0xff] }
  0x1c   :  { %1715 = vmatprep.mubr.msk.f32.mxu0 %vm264_vm3, %v2260_v36  ;;  %v349_v38 = vld [vmem:[%s2459_s8] sm:$0xff]  ;;  %v939_v13 = vld [vmem:[#allocation2 + $0x88] sm:$0xff]  ;;  %v933_v48 = vld [vmem:[#allocation2 + $0x58] sm:$0xff] }
  0x1d   :  { %1827 = vmatpush3.bf16.msra.mxu1 %v2190_v12  ;;  %v2289_v55 = vld [vmem:[%s2458_s7] sm:$0xff]  ;;  %v923_v16 = vld [vmem:[#allocation2 + $0x8] sm:$0xff] }
  0x1e   :  { %1828 = vmatprep.subr.bf16.mxu1 %v2068_v2  ;;  %v430_v58 = vld [vmem:[%s2452_s1] sm:$0xff]  ;;  %v943_v25 = vld [vmem:[#allocation2 + $0xa8] sm:$0xff] }
  0x1f   :  { %352 = vperm.xlu1 %2037, %v349_v38   ;;  %v922_v14 = vld [vmem:[#allocation2] sm:$0xff]  ;;  %v927_v28 = vld [vmem:[#allocation2 + $0x28] sm:$0xff] }
  0x20   :  { %v1878_v17 = vpack.c.bf16 %v923_v16, %v922_v14  ;;  %v947_v37 = vld [vmem:[#allocation2 + $0xc8] sm:$0xff]  ;;  %v930_v38 = vld [vmem:[#allocation2 + $0x40] sm:$0xff]  ;;  %v977_v14 = vld [vmem:[#allocation2 + $0x1b8] sm:$0xff] }
  0x21   :  { %1830 = vmatpush3.bf16.msra.mxu1 %v2200_v15 }
  0x22   :  { %1831 = vmatprep.subr.bf16.mxu1 %v2068_v2 }
  0x25   :  { %1833 = vmatpush3.bf16.msra.mxu1 %v2210_v18 }
  0x26   :  { %1834 = vmatprep.subr.bf16.mxu1 %v2068_v2 }
  0x29   :  { %1836 = vmatpush3.bf16.msra.mxu1 %v2220_v21 }
  0x2a   :  { %1837 = vmatprep.subr.bf16.mxu1 %v2068_v2 }
  0x2d   :  { %1839 = vmatpush3.bf16.msra.mxu1 %v2230_v24 }
  0x2e   :  { %1840 = vmatprep.subr.bf16.mxu1 %v2068_v2 }
  0x31   :  { %1842 = vmatpush3.bf16.msra.mxu1 %v2240_v27 }
  0x32   :  { %1843 = vmatprep.subr.bf16.mxu1 %v2068_v2 }
  0x35   :  { %1845 = vmatpush3.bf16.msra.mxu1 %v2251_v30 }
  0x95   :  { %v2254_v31 = vpop.permute.xlu0 %82 }
  0x99   :  { %v2282_v45 = vpop.permute.xlu0 %256 }
  0x9a   :  { %v2280_v43 = vpop.permute.xlu1 %261 }
  0x9e   :  { %v2334_v60 = vpop.permute.xlu1 %352 }
  0xea   :  { %v159_v32 = vpop.f32.mrb[0].mxu0 }
  0xeb   :  { %v160_v33 = vadd.f32 %v159_v32, %v2254_v31  ;;  %v1677_v34 = vpop.f32.mrb[1].mxu0  ;;  %v928_v32 = vld [vmem:[#allocation2 + $0x30] sm:$0xff] }
  0xec   :  { %v929_v34 = vld [vmem:[#allocation2 + $0x38] sm:$0xff] }
  0xed   :  { %v163_v35 = vmax.f32 %v160_v33, 0.0 }
  0xef   :  { %1711 = vmatmul.mubr.f32.vlgmr.msra.gmra.mrb[0].mxu1 %v163_v35  ;;  %v1890_v35 = vpack.c.bf16 %v929_v34, %v928_v32  ;;  %v950_v32 = vld [vmem:[#allocation2 + $0xe0] sm:$0xff] }
 0x1c2   :  { %v246_v39 = vpop.f32.mrb[0].mxu1 }
 0x1c3   :  { %v1712_v41 = vpop.f32.mrb[1].mxu1  ;;  %1713 = vmatprep.subr.mxu0 %v246_v39 }
 0x1c4   :  { %1714 = vmatpush3.msra.mxu0 %v246_v39 }
 0x1c5   :  { %1716 = vmatmul.mubr.msk.f32.vlgmr.msra.gmra.mrb[2].mxu0 %vm264_vm3, %v2273_v40  ;;  %1846 = vmatprep.subr.bf16.mxu0 %v2068_v2 }
 0x1c6   :  { %1722 = vmatprep.mubr.msk.f32.mxu0 %vm2066_vm0, %v2065_v0 }
 0x298   :  { %v1717_v44 = vpop.f32.mrb[2].mxu0 }
 0x299   :  { %v343_v46 = vadd.f32 %v1717_v44, %v2280_v43  ;;  %v337_v47 = vpop.f32.mrb[3].mxu0  ;;  %v949_v44 = vld [vmem:[#allocation2 + $0xd8] sm:$0xff] }
 0x29a   :  { %v338_v49 = vadd.f32 %v337_v47, %v2282_v45  ;;  %v1896_v47 = vpack.c.bf16 %v949_v44, %v948_v42 }
 0x29b   :  { %v347_v50 = vmax.f32 %v343_v46, 0.0  ;;  %v932_v46 = vld [vmem:[#allocation2 + $0x50] sm:$0xff] }
 0x29c   :  { %v346_v51 = vmax.f32 %v338_v49, 0.0  ;;  %v1898_v49 = vpack.c.bf16 %v933_v48, %v932_v46  ;;  %v952_v46 = vld [vmem:[#allocation2 + $0xf0] sm:$0xff] }
 0x29e   :  { %v1847_v54 = vpack.c.bf16 %v347_v50, %v346_v51 }
 0x2a0   :  { %1848 = vmatpush3.bf16.msra.mxu0 %v1847_v54 }
 0x2a1   :  { %1725 = vmatprep.subr.mxu0 %v2065_v0 }
 0x2a3   :  { %1723 = vmatmul.mubr.msk.f32.vlgmr.msra.gmra.mrb[4].mxu0 %vm355_vm4, %v2289_v55 }
 0x2a4   :  { %1726 = vmatpush3.msk.msra.mxu0 %vm2292_vm5, %v2069_v57  ;;  %1727 = vmatprep.mubr.msk.f32.mxu0 %vm2066_vm0, %v2065_v0 }
 0x2a5   :  { %1730 = vmatprep.subr.mxu0 %v2065_v0 }
 0x2a7   :  { %1728 = vmatmul.mubr.msk.f32.vlgmr.msra.gmra.mrb[6].mxu0 %vm264_vm3, %v430_v58 }
 0x2a8   :  { %1731 = vmatpush3.msk.msra.mxu0 %vm89_vm1, %v1445_v59  ;;  %1732 = vmatprep.mubr.msk.f32.mxu0 %vm2066_vm0, %v2065_v0 }
 0x2a9   :  { %1849 = vmatprep.subr.bf16.mxu0 %v2068_v2 }
 0x2ab   :  { %1733 = vmatmul.mubr.msk.f32.vlgmr.msra.gmra.mrb[8].mxu0 %vm85_vm2, %v2164_v4 }
 0x2ac   :  { %1851 = vmatpush3.bf16.msra.mxu0 %v2181_v9  ;;  %1767 = vmatprep.mubr.msk.f32.mxu0 %vm2066_vm0, %v2065_v0 }
 0x2ad   :  { %1852 = vmatprep.subr.bf16.mxu0 %v2068_v2 }
 0x2b0   :  { %1854 = vmatpush3.bf16.msra.mxu0 %v2190_v12  ;;  %v938_v12 = vld [vmem:[#allocation2 + $0x80] sm:$0xff] }
 0x2b1   :  { %1855 = vmatprep.subr.bf16.mxu0 %v2068_v2 }
 0x2b4   :  { %1857 = vmatpush3.bf16.msra.mxu0 %v2200_v15  ;;  %v1876_v15 = vpack.c.bf16 %v939_v13, %v938_v12  ;;  %v959_v12 = vld [vmem:[#allocation2 + $0x128] sm:$0xff]  ;;  %v976_v13 = vld [vmem:[#allocation2 + $0x1b0] sm:$0xff] }
 0x2b5   :  { %1858 = vmatprep.subr.bf16.mxu0 %v2068_v2  ;;  %v1920_v16 = vpack.c.bf16 %v977_v14, %v976_v13 }
 0x2b6   :  { %1877 = vmatprep.subr.bf16.mxu1 %v1876_v15 }
 0x2b7   :  { %1879 = vmatpush3.bf16.msra.mxu1 %v1878_v17  ;;  %v960_v17 = vld [vmem:[#allocation2 + $0x130] sm:$0xff] }
 0x2b8   :  { %1860 = vmatpush3.bf16.msra.mxu0 %v2210_v18  ;;  %v940_v18 = vld [vmem:[#allocation2 + $0x90] sm:$0xff] }
 0x2b9   :  { %1861 = vmatprep.subr.bf16.mxu0 %v2068_v2  ;;  %v1880_v22 = vpack.c.bf16 %v941_v19, %v940_v18  ;;  %v961_v18 = vld [vmem:[#allocation2 + $0x138] sm:$0xff]  ;;  %v978_v19 = vld [vmem:[#allocation2 + $0x1c0] sm:$0xff] }
 0x2bb   :  { %1881 = vmatprep.subr.bf16.mxu1 %v1880_v22 }
 0x2bc   :  { %1863 = vmatpush3.bf16.msra.mxu0 %v2220_v21  ;;  %v925_v21 = vld [vmem:[#allocation2 + $0x18] sm:$0xff] }
 0x2bd   :  { %1864 = vmatprep.subr.bf16.mxu0 %v2068_v2  ;;  %v1882_v23 = vpack.c.bf16 %v925_v21, %v924_v20  ;;  %v979_v20 = vld [vmem:[#allocation2 + $0x1c8] sm:$0xff]  ;;  %v1922_v21 = vpack.c.bf16 %v961_v18, %v960_v17 }
 0x2be   :  { %v1924_v22 = vpack.c.bf16 %v979_v20, %v978_v19  ;;  %v1036_v19 = vld [vmem:[#allocation2 + $0x390] sm:$0xff]  ;;  %v1037_v20 = vld [vmem:[#allocation2 + $0x398] sm:$0xff] }
 0x2bf   :  { %1883 = vmatpush3.bf16.msra.mxu1 %v1882_v23  ;;  %v962_v23 = vld [vmem:[#allocation2 + $0x140] sm:$0xff] }
 0x2c0   :  { %1866 = vmatpush3.bf16.msra.mxu0 %v2230_v24  ;;  %v942_v24 = vld [vmem:[#allocation2 + $0xa0] sm:$0xff] }
 0x2c1   :  { %1867 = vmatprep.subr.bf16.mxu0 %v2068_v2  ;;  %v1884_v26 = vpack.c.bf16 %v943_v25, %v942_v24  ;;  %v963_v24 = vld [vmem:[#allocation2 + $0x148] sm:$0xff]  ;;  %v980_v25 = vld [vmem:[#allocation2 + $0x1d0] sm:$0xff] }
 0x2c3   :  { %1885 = vmatprep.subr.bf16.mxu1 %v1884_v26  ;;  %v981_v26 = vld [vmem:[#allocation2 + $0x1d8] sm:$0xff] }
 0x2c4   :  { %1869 = vmatpush3.bf16.msra.mxu0 %v2240_v27  ;;  %v926_v27 = vld [vmem:[#allocation2 + $0x20] sm:$0xff] }
 0x2c5   :  { %1870 = vmatprep.subr.bf16.mxu0 %v2068_v2  ;;  %v1886_v29 = vpack.c.bf16 %v927_v28, %v926_v27  ;;  %v1926_v27 = vpack.c.bf16 %v963_v24, %v962_v23  ;;  %v1928_v28 = vpack.c.bf16 %v981_v26, %v980_v25 }
 0x2c7   :  { %1887 = vmatpush3.bf16.msra.mxu1 %v1886_v29  ;;  %v964_v29 = vld [vmem:[#allocation2 + $0x150] sm:$0xff] }
 0x2c8   :  { %1872 = vmatpush3.bf16.msra.mxu0 %v2251_v30  ;;  %v944_v30 = vld [vmem:[#allocation2 + $0xb0] sm:$0xff] }
 0x376   :  { %v425_v61 = vpop.f32.mrb[4].mxu0 }
 0x377   :  { %v426_v62 = vadd.f32 %v425_v61, %v2334_v60  ;;  %v1724_v63 = vpop.f32.mrb[5].mxu0  ;;  %v970_v61 = vld [vmem:[#allocation2 + $0x180] sm:$0xff] }
 0x379   :  { %v429_v1 = vmax.f32 %v426_v62, 0.0  ;;  %v971_v62 = vld [vmem:[#allocation2 + $0x188] sm:$0xff] }
 0x37a   :  { %v500_v3 = vpop.f32.mrb[6].mxu0  ;;  %v1908_v63 = vpack.c.bf16 %v971_v62, %v970_v61  ;;  %v1002_v62 = vld [vmem:[#allocation2 + $0x280] sm:$0xff] }
 0x37b   :  { %v2337_v4 = vmul.f32 %v500_v3, %v429_v1  ;;  %v1729_v5 = vpop.f32.mrb[7].mxu0  ;;  %v954_v1 = vld [vmem:[#allocation2 + $0x100] sm:$0xff]  ;;  %v955_v3 = vld [vmem:[#allocation2 + $0x108] sm:$0xff] }
 0x37c   :  { %v972_v5 = vld [vmem:[#allocation2 + $0x190] sm:$0xff] }
 0x37d   :  { %v506_v13 = vrot.slane %v2337_v4, 1  ;;  %v510_v14 = vrot.slane %v2337_v4, 3  ;;  %v518_v18 = vrot.slane %v2337_v4, 7  ;;  %v516_v25 = vrot.slane %v2337_v4, 6 }
 0x37e   :  { %v591_v6 = vpop.f32.mrb[8].mxu0 }
 0x37f   :  { %v592_v7 = vadd.f32 %v591_v6, %v2254_v31  ;;  %v1734_v8 = vpop.f32.mrb[9].mxu0  ;;  %v945_v31 = vld [vmem:[#allocation2 + $0xb8] sm:$0xff] }
 0x380   :  { %v1888_v33 = vpack.c.bf16 %v945_v31, %v944_v30  ;;  %v973_v6 = vld [vmem:[#allocation2 + $0x198] sm:$0xff]  ;;  %v956_v8 = vld [vmem:[#allocation2 + $0x110] sm:$0xff] }
 0x381   :  { %v595_v9 = vmax.f32 %v592_v7, 0.0  ;;  %v1912_v7 = vpack.c.bf16 %v973_v6, %v972_v5  ;;  %v965_v30 = vld [vmem:[#allocation2 + $0x158] sm:$0xff]  ;;  %v1035_v5 = vld [vmem:[#allocation2 + $0x388] sm:$0xff] }
 0x382   :  { %1889 = vmatprep.subr.bf16.mxu1 %v1888_v33  ;;  %v1930_v31 = vpack.c.bf16 %v965_v30, %v964_v29  ;;  %v951_v33 = vld [vmem:[#allocation2 + $0xe8] sm:$0xff] }
 0x383   :  { %1768 = vmatmul.mubr.f32.vlgmr.msra.gmra.mrb[10].mxu0 %v595_v9  ;;  %1891 = vmatpush3.bf16.msra.mxu1 %v1890_v35  ;;  %v957_v9 = vld [vmem:[#allocation2 + $0x118] sm:$0xff]  ;;  %v1900_v34 = vpack.c.bf16 %v951_v33, %v950_v32  ;;  %v934_v35 = vld [vmem:[#allocation2 + $0x60] sm:$0xff]  ;;  %v1976_v33 = vpack.c.bf16 %v1037_v20, %v1036_v19  ;;  %v1027_v19 = vld [vmem:[#allocation2 + $0x348] sm:$0xff] }
 0x384   :  { %1772 = vmatprep.mubr.msk.f32.mxu0 %vm264_vm3, %v2260_v36  ;;  %v946_v36 = vld [vmem:[#allocation2 + $0xc0] sm:$0xff]  ;;  %v989_v32 = vld [vmem:[#allocation2 + $0x218] sm:$0xff]  ;;  %v1012_v20 = vld [vmem:[#allocation2 + $0x2d0] sm:$0xff] }
 0x385   :  { %v1892_v39 = vpack.c.bf16 %v947_v37, %v946_v36  ;;  %v935_v36 = vld [vmem:[#allocation2 + $0x68] sm:$0xff]  ;;  %v982_v37 = vld [vmem:[#allocation2 + $0x1e0] sm:$0xff] }
 0x387   :  { %1893 = vmatprep.subr.bf16.mxu1 %v1892_v39  ;;  %v983_v39 = vld [vmem:[#allocation2 + $0x1e8] sm:$0xff] }
 0x388   :  { %v1932_v42 = vpack.c.bf16 %v983_v39, %v982_v37 }
 0x456   :  { %v662_v10 = vpop.f32.mrb[10].mxu0 }
 0x457   :  { %v1769_v11 = vpop.f32.mrb[11].mxu0  ;;  %1770 = vmatprep.subr.mxu0 %v662_v10 }
 0x458   :  { %1771 = vmatpush3.msra.mxu0 %v662_v10  ;;  %v974_v10 = vld [vmem:[#allocation2 + $0x1a0] sm:$0xff]  ;;  %v975_v11 = vld [vmem:[#allocation2 + $0x1a8] sm:$0xff] }
 0x459   :  { %1773 = vmatmul.mubr.msk.f32.vlgmr.msra.gmra.mrb[12].mxu0 %vm264_vm3, %v2273_v40  ;;  %1873 = vmatprep.subr.bf16.mxu0 %v2068_v2  ;;  %v931_v40 = vld [vmem:[#allocation2 + $0x48] sm:$0xff]  ;;  %v1916_v56 = vpack.c.bf16 %v975_v11, %v974_v10  ;;  %v1018_v10 = vld [vmem:[#allocation2 + $0x300] sm:$0xff] }
 0x45a   :  { %1779 = vmatprep.mubr.msk.f32.mxu0 %vm2066_vm0, %v2065_v0  ;;  %v1894_v41 = vpack.c.bf16 %v931_v40, %v930_v38  ;;  %v1902_v38 = vpack.c.bf16 %v935_v36, %v934_v35  ;;  %v966_v40 = vld [vmem:[#allocation2 + $0x160] sm:$0xff] }
 0x45c   :  { %1895 = vmatpush3.bf16.msra.mxu1 %v1894_v41  ;;  %v967_v41 = vld [vmem:[#allocation2 + $0x168] sm:$0xff] }
 0x45d   :  { %1897 = vmatprep.subr.bf16.mxu1 %v1896_v47  ;;  %v1934_v44 = vpack.c.bf16 %v967_v41, %v966_v40  ;;  %v953_v47 = vld [vmem:[#allocation2 + $0xf8] sm:$0xff] }
 0x45e   :  { %v1904_v48 = vpack.c.bf16 %v953_v47, %v952_v46  ;;  %v1021_v41 = vld [vmem:[#allocation2 + $0x318] sm:$0xff]  ;;  %v1038_v47 = vld [vmem:[#allocation2 + $0x3a0] sm:$0xff] }
 0x460   :  { %1899 = vmatpush3.bf16.msra.mxu1 %v1898_v49  ;;  %v936_v49 = vld [vmem:[#allocation2 + $0x70] sm:$0xff] }
 0x461   :  { %1901 = vmatprep.subr.bf16.mxu1 %v1900_v34  ;;  %v1020_v34 = vld [vmem:[#allocation2 + $0x310] sm:$0xff] }
 0x464   :  { %1903 = vmatpush3.bf16.msra.mxu1 %v1902_v38 }
 0x465   :  { %1905 = vmatprep.subr.bf16.mxu1 %v1904_v48  ;;  %v1039_v48 = vld [vmem:[#allocation2 + $0x3a8] sm:$0xff] }
 0x52c   :  { %v1774_v50 = vpop.f32.mrb[12].mxu0 }
 0x52d   :  { %v738_v51 = vadd.f32 %v1774_v50, %v2280_v43  ;;  %v732_v52 = vpop.f32.mrb[13].mxu0  ;;  %v1451_v43 = vld [vmem:[%s2452_s1 + $0x8] sm:$0xff]  ;;  %v937_v50 = vld [vmem:[#allocation2 + $0x78] sm:$0xff] }
 0x52e   :  { %v733_v53 = vadd.f32 %v732_v52, %v2282_v45  ;;  %v1910_v45 = vpack.c.bf16 %v955_v3, %v954_v1  ;;  %v1906_v52 = vpack.c.bf16 %v937_v50, %v936_v49  ;;  %v1034_v3 = vld [vmem:[#allocation2 + $0x380] sm:$0xff] }
 0x52f   :  { %v742_v54 = vmax.f32 %v738_v51, 0.0  ;;  %v984_v51 = vld [vmem:[#allocation2 + $0x1f0] sm:$0xff]  ;;  %v1972_v6 = vpack.c.bf16 %v1035_v5, %v1034_v3  ;;  %v1041_v5 = vld [vmem:[#allocation2 + $0x3b8] sm:$0xff] }
 0x530   :  { %v741_v58 = vmax.f32 %v733_v53, 0.0  ;;  %v985_v53 = vld [vmem:[#allocation2 + $0x1f8] sm:$0xff]  ;;  %1907 = vmatpush3.bf16.msra.mxu1 %v1906_v52  ;;  %v1978_v52 = vpack.c.bf16 %v1021_v41, %v1020_v34  ;;  %v1040_v3 = vld [vmem:[#allocation2 + $0x3b0] sm:$0xff]  ;;  %v1046_v34 = vld [vmem:[#allocation2 + $0x3e0] sm:$0xff] }
 0x531   :  { %v1030_v41 = vld [vmem:[#allocation2 + $0x360] sm:$0xff] }
 0x532   :  { %v1874_v59 = vpack.c.bf16 %v742_v54, %v741_v58  ;;  %v968_v54 = vld [vmem:[#allocation2 + $0x170] sm:$0xff]  ;;  %v969_v58 = vld [vmem:[#allocation2 + $0x178] sm:$0xff] }
 0x533   :  { %v1938_v61 = vpack.c.bf16 %v969_v58, %v968_v54  ;;  %v990_v54 = vld [vmem:[#allocation2 + $0x220] sm:$0xff]  ;;  %v991_v58 = vld [vmem:[#allocation2 + $0x228] sm:$0xff] }
 0x534   :  { %1875 = vmatpush3.bf16.msra.mxu0 %v1874_v59  ;;  %v1936_v59 = vpack.c.bf16 %v985_v53, %v984_v51 }
 0x535   :  { %1782 = vmatprep.subr.mxu0 %v2065_v0 }
 0x537   :  { %1780 = vmatmul.mubr.msk.f32.vlgmr.msra.gmra.mrb[14].mxu0 %vm355_vm4, %v2289_v55  ;;  %v1914_v55 = vpack.c.bf16 %v957_v9, %v956_v8  ;;  %v986_v8 = vld [vmem:[#allocation2 + $0x200] sm:$0xff]  ;;  %v987_v9 = vld [vmem:[#allocation2 + $0x208] sm:$0xff] }
 0x538   :  { %1783 = vmatpush3.msk.msra.mxu0 %vm2292_vm5, %v2069_v57  ;;  %1784 = vmatprep.mubr.msk.f32.mxu0 %vm2066_vm0, %v2065_v0  ;;  %v958_v57 = vld [vmem:[#allocation2 + $0x120] sm:$0xff] }
 0x539   :  { %1909 = vmatprep.subr.bf16.mxu0 %v1908_v63  ;;  %v1918_v15 = vpack.c.bf16 %v959_v12, %v958_v57  ;;  %v1003_v63 = vld [vmem:[#allocation2 + $0x288] sm:$0xff]  ;;  %v1005_v57 = vld [vmem:[#allocation2 + $0x298] sm:$0xff] }
 0x53a   :  { %v1940_v1 = vpack.c.bf16 %v1003_v63, %v1002_v62  ;;  %v1023_v62 = vld [vmem:[#allocation2 + $0x328] sm:$0xff]  ;;  %v1008_v63 = vld [vmem:[#allocation2 + $0x2b0] sm:$0xff] }
 0x53b   :  { %1785 = vmatmul.mubr.msk.f32.vlgmr.msra.gmra.mrb[16].mxu0 %vm264_vm3, %v1451_v43 }
 0x53c   :  { %1911 = vmatpush3.bf16.msra.mxu0 %v1910_v45  ;;  %1941 = vmatprep.subr.bf16.mxu1 %v1940_v1  ;;  %v1009_v1 = vld [vmem:[#allocation2 + $0x2b8] sm:$0xff] }
 0x53d   :  { %1913 = vmatprep.subr.bf16.mxu0 %v1912_v7 }
 0x540   :  { %1915 = vmatpush3.bf16.msra.mxu0 %v1914_v55  ;;  %v1019_v55 = vld [vmem:[#allocation2 + $0x308] sm:$0xff] }
 0x541   :  { %1917 = vmatprep.subr.bf16.mxu0 %v1916_v56  ;;  %v1004_v56 = vld [vmem:[#allocation2 + $0x290] sm:$0xff]  ;;  %v1974_v23 = vpack.c.bf16 %v1019_v55, %v1018_v10  ;;  %v1984_v10 = vpack.c.bf16 %v1041_v5, %v1040_v3  ;;  %v1010_v55 = vld [vmem:[#allocation2 + $0x2c0] sm:$0xff]  ;;  %v1339_v5 = vld [vmem:[%s2462_s11 + $0x8] sm:$0xff] }
 0x542   :  { %v1944_v24 = vpack.c.bf16 %v1005_v57, %v1004_v56  ;;  %v1011_v56 = vld [vmem:[#allocation2 + $0x2c8] sm:$0xff]  ;;  %v1042_v57 = vld [vmem:[#allocation2 + $0x3c0] sm:$0xff] }
 0x543   :  { %v1338_v3 = vld [vmem:[%s2462_s11] sm:$0xff] }
 0x544   :  { %1919 = vmatpush3.bf16.msra.mxu0 %v1918_v15  ;;  %v508_v15 = vrot.slane %v2337_v4, 2 }
 0x545   :  { %1921 = vmatprep.subr.bf16.mxu0 %v1920_v16 }
 0x548   :  { %1923 = vmatpush3.bf16.msra.mxu0 %v1922_v21  ;;  %v512_v21 = vrot.slane %v2337_v4, 4 }
 0x549   :  { %1925 = vmatprep.subr.bf16.mxu0 %v1924_v22  ;;  %v1942_v22 = vpack.c.bf16 %v987_v9, %v986_v8  ;;  %v993_v8 = vld [vmem:[#allocation2 + $0x238] sm:$0xff]  ;;  %v1024_v9 = vld [vmem:[#allocation2 + $0x330] sm:$0xff] }
 0x54c   :  { %1927 = vmatpush3.bf16.msra.mxu0 %v1926_v27 }
 0x54d   :  { %1929 = vmatprep.subr.bf16.mxu0 %v1928_v28 }
 0x550   :  { %1931 = vmatpush3.bf16.msra.mxu0 %v1930_v31  ;;  %v988_v31 = vld [vmem:[#allocation2 + $0x210] sm:$0xff] }
 0x551   :  { %1933 = vmatprep.subr.bf16.mxu0 %v1932_v42  ;;  %v1006_v42 = vld [vmem:[#allocation2 + $0x2a0] sm:$0xff]  ;;  %v1946_v51 = vpack.c.bf16 %v989_v32, %v988_v31  ;;  %v1029_v31 = vld [vmem:[#allocation2 + $0x358] sm:$0xff] }
 0x552   :  { %v1014_v32 = vld [vmem:[#allocation2 + $0x2e0] sm:$0xff] }
 0x554   :  { %1935 = vmatpush3.bf16.msra.mxu0 %v1934_v44  ;;  %v1007_v44 = vld [vmem:[#allocation2 + $0x2a8] sm:$0xff] }
 0x555   :  { %1937 = vmatprep.subr.bf16.mxu0 %v1936_v59  ;;  %v1948_v53 = vpack.c.bf16 %v1007_v44, %v1006_v42  ;;  %v1022_v59 = vld [vmem:[#allocation2 + $0x320] sm:$0xff]  ;;  %v1031_v44 = vld [vmem:[#allocation2 + $0x368] sm:$0xff] }
 0x558   :  { %1939 = vmatpush3.bf16.msra.mxu0 %v1938_v61  ;;  %v1980_v61 = vpack.c.bf16 %v1039_v48, %v1038_v47  ;;  %v1017_v47 = vld [vmem:[#allocation2 + $0x2f8] sm:$0xff]  ;;  %v1048_v48 = vld [vmem:[#allocation2 + $0x3f0] sm:$0xff] }
 0x559   :  { %1973 = vmatprep.subr.bf16.mxu0 %v1972_v6  ;;  %v1950_v6 = vpack.c.bf16 %v991_v58, %v990_v54  ;;  %v1000_v54 = vld [vmem:[#allocation2 + $0x270] sm:$0xff]  ;;  %v1001_v58 = vld [vmem:[#allocation2 + $0x278] sm:$0xff] }
 0x60a   :  { %v809_v43 = vpop.f32.mrb[14].mxu0 }
 0x60b   :  { %v810_v45 = vadd.f32 %v809_v43, %v2334_v60  ;;  %v1781_v7 = vpop.f32.mrb[15].mxu0  ;;  %v514_v60 = vrot.slane %v2337_v4, 5  ;;  %v1982_v43 = vpack.c.bf16 %v1023_v62, %v1022_v59  ;;  %v1033_v62 = vld [vmem:[#allocation2 + $0x378] sm:$0xff] }
 0x60c   :  { %v992_v7 = vld [vmem:[#allocation2 + $0x230] sm:$0xff] }
 0x60d   :  { %v813_v11 = vmax.f32 %v810_v45, 0.0  ;;  %v1952_v45 = vpack.c.bf16 %v1009_v1, %v1008_v63  ;;  %v1970_v63 = vpack.c.bf16 %v1001_v58, %v1000_v54 }
 0x60e   :  { %v885_v12 = vpop.f32.mrb[16].mxu0 }
 0x60f   :  { %v889_v16 = vmul.f32 %v885_v12, %v813_v11  ;;  %v1786_v17 = vpop.f32.mrb[17].mxu0  ;;  %v1025_v11 = vld [vmem:[#allocation2 + $0x338] sm:$0xff]  ;;  %v1043_v12 = vld [vmem:[#allocation2 + $0x3c8] sm:$0xff] }
 0x610   :  { %v995_v17 = vld [vmem:[#allocation2 + $0x248] sm:$0xff] }
 0x611   :  { %v915_v26 = vsel %vm913_vm6, %v506_v13, %v889_v16  ;;  %v897_v27 = vrot.slane %v889_v16, 7  ;;  %v1456_v28 = vrot.slane %v889_v16, 10  ;;  %v1455_v29 = vrot.slane %v889_v16, 9 }
 0x612   :  { %1121 = vmatprep.mubr.f32.mxu1 %v915_v26  ;;  %v1458_v30 = vrot.slane %v889_v16, 12  ;;  %v1457_v35 = vrot.slane %v889_v16, 11  ;;  %v1459_v36 = vrot.slane %v889_v16, 13  ;;  %v1954_v13 = vpack.c.bf16 %v993_v8, %v992_v7  ;;  %v994_v16 = vld [vmem:[#allocation2 + $0x240] sm:$0xff]  ;;  %v1344_v8 = vld [vmem:[%s2462_s11 + $0x30] sm:$0xff] }
 0x613   :  { %v914_v37 = vsel %vm913_vm6, %v2337_v4, %v897_v27  ;;  %v917_v38 = vsel %vm913_vm6, %v510_v14, %v1456_v28  ;;  %v916_v39 = vsel %vm913_vm6, %v508_v15, %v1455_v29  ;;  %v904_v40 = vrot.slane %v897_v27, 7  ;;  %v996_v27 = vld [vmem:[#allocation2 + $0x250] sm:$0xff]  ;;  %v997_v28 = vld [vmem:[#allocation2 + $0x258] sm:$0xff] }
 0x614   :  { %1122 = vmatmul.mubr.f32.vlgmr.msra.gmra.mrb[2].mxu1 %v914_v37  ;;  %1191 = vmatprep.mubr.f32.mxu0 %v917_v38  ;;  %v919_v46 = vsel %vm913_vm6, %v514_v60, %v1458_v30  ;;  %v2376_v49 = vsel %vm913_vm6, %v512_v21, %v1457_v35  ;;  %v2379_v50 = vsel %vm913_vm6, %v516_v25, %v1459_v36  ;;  %v1026_v60 = vld [vmem:[#allocation2 + $0x340] sm:$0xff]  ;;  %v1013_v21 = vld [vmem:[#allocation2 + $0x2d8] sm:$0xff]  ;;  %v1028_v29 = vld [vmem:[#allocation2 + $0x350] sm:$0xff] }
 0x615   :  { %1943 = vmatpush3.bf16.msra.mxu1 %v1942_v22  ;;  %1192 = vmatmul.mubr.f32.vlgmr.msra.gmra.mrb[18].mxu0 %v916_v39  ;;  %v921_v4 = vsel %vm913_vm6, %v518_v18, %v904_v40  ;;  %v1986_v14 = vpack.c.bf16 %v1025_v11, %v1024_v9  ;;  %v1956_v15 = vpack.c.bf16 %v1011_v56, %v1010_v55  ;;  %v1044_v22 = vld [vmem:[#allocation2 + $0x3d0] sm:$0xff]  ;;  %v1047_v35 = vld [vmem:[#allocation2 + $0x3e8] sm:$0xff]  ;;  %v998_v39 = vld [vmem:[#allocation2 + $0x260] sm:$0xff] }
 0x616   :  { %1261 = vmatprep.mubr.f32.mxu1 %v919_v46  ;;  %1975 = vmatpush3.bf16.msra.mxu0 %v1974_v23  ;;  %v1988_v18 = vpack.c.bf16 %v1043_v12, %v1042_v57  ;;  %v1045_v23 = vld [vmem:[#allocation2 + $0x3d8] sm:$0xff]  ;;  %v1990_v25 = vpack.c.bf16 %v1027_v19, %v1026_v60  ;;  %v1960_v26 = vpack.c.bf16 %v1013_v21, %v1012_v20  ;;  %v999_v40 = vld [vmem:[#allocation2 + $0x268] sm:$0xff]  ;;  %v1016_v46 = vld [vmem:[#allocation2 + $0x2f0] sm:$0xff] }
 0x617   :  { %1331 = vmatprep.mubr.f32.mxu0 %v921_v4  ;;  %1945 = vmatprep.subr.bf16.mxu1 %v1944_v24  ;;  %v1958_v24 = vpack.c.bf16 %v995_v17, %v994_v16  ;;  %v1992_v30 = vpack.c.bf16 %v1045_v23, %v1044_v22  ;;  %v1962_v36 = vpack.c.bf16 %v997_v28, %v996_v27  ;;  %v1049_v4 = vld [vmem:[#allocation2 + $0x3f8] sm:$0xff]  ;;  %v1346_v11 = vld [vmem:[%s2462_s11 + $0x40] sm:$0xff]  ;;  %v1347_v55 = vld [vmem:[%s2462_s11 + $0x48] sm:$0xff] }
 0x618   :  { %1977 = vmatprep.subr.bf16.mxu0 %v1976_v33  ;;  %v1015_v33 = vld [vmem:[#allocation2 + $0x2e8] sm:$0xff]  ;;  %v1994_v37 = vpack.c.bf16 %v1029_v31, %v1028_v29  ;;  %v1996_v42 = vpack.c.bf16 %v1047_v35, %v1046_v34  ;;  %v2000_v59 = vpack.c.bf16 %v1049_v4, %v1048_v48  ;;  %v1345_v9 = vld [vmem:[%s2462_s11 + $0x38] sm:$0xff]  ;;  %v2017_v56 = vpack.c.bf16 %v1347_v55, %v1346_v11  ;;  %v1348_v57 = vld [vmem:[%s2462_s11 + $0x50] sm:$0xff] }
 0x619   :  { %1947 = vmatpush3.bf16.msra.mxu1 %v1946_v51  ;;  %v1964_v38 = vpack.c.bf16 %v1015_v33, %v1014_v32  ;;  %v1966_v51 = vpack.c.bf16 %v999_v40, %v998_v39  ;;  %v1349_v12 = vld [vmem:[%s2462_s11 + $0x58] sm:$0xff]  ;;  %v1352_v17 = vld [vmem:[%s2462_s11 + $0x70] sm:$0xff]  ;;  %v1460_v20 = vld [vmem:[%s2461_s10] ss:$0 sm:$0xff] }
 0x61a   :  { %1979 = vmatpush3.bf16.msra.mxu0 %v1978_v52  ;;  %1949 = vmatprep.subr.bf16.mxu1 %v1948_v53  ;;  %v1998_v52 = vpack.c.bf16 %v1031_v44, %v1030_v41  ;;  %v1968_v53 = vpack.c.bf16 %v1017_v47, %v1016_v46  ;;  %v1353_v60 = vld [vmem:[%s2462_s11 + $0x78] sm:$0xff] }
 0x61b   :  { %1981 = vmatprep.subr.bf16.mxu0 %v1980_v61  ;;  %v1032_v61 = vld [vmem:[#allocation2 + $0x370] sm:$0xff] }
 0x61c   :  { %v2002_v1 = vpack.c.bf16 %v1033_v62, %v1032_v61 }
 0x61d   :  { %1951 = vmatpush3.bf16.msra.mxu1 %v1950_v6  ;;  %v1340_v6 = vld [vmem:[%s2462_s11 + $0x10] sm:$0xff] }
 0x61e   :  { %1983 = vmatpush3.bf16.msra.mxu0 %v1982_v43  ;;  %1953 = vmatprep.subr.bf16.mxu1 %v1952_v45  ;;  %v2005_v43 = vpack.c.bf16 %v1339_v5, %v1338_v3  ;;  %v1343_v45 = vld [vmem:[%s2462_s11 + $0x28] sm:$0xff] }
 0x61f   :  { %1985 = vmatprep.subr.bf16.mxu0 %v1984_v10  ;;  %v2014_v10 = vpack.c.bf16 %v1345_v9, %v1344_v8 }
 0x621   :  { %1955 = vmatpush3.bf16.msra.mxu1 %v1954_v13  ;;  %v2020_v13 = vpack.c.bf16 %v1349_v12, %v1348_v57 }
 0x622   :  { %1987 = vmatpush3.bf16.msra.mxu0 %v1986_v14  ;;  %1957 = vmatprep.subr.bf16.mxu1 %v1956_v15  ;;  %v1350_v14 = vld [vmem:[%s2462_s11 + $0x60] sm:$0xff]  ;;  %v1351_v15 = vld [vmem:[%s2462_s11 + $0x68] sm:$0xff] }
 0x623   :  { %1989 = vmatprep.subr.bf16.mxu0 %v1988_v18  ;;  %v2023_v16 = vpack.c.bf16 %v1351_v15, %v1350_v14  ;;  %v2026_v18 = vpack.c.bf16 %v1353_v60, %v1352_v17 }
 0x625   :  { %1959 = vmatpush3.bf16.msra.mxu1 %v1958_v24 }
 0x626   :  { %1991 = vmatpush3.bf16.msra.mxu0 %v1990_v25  ;;  %1961 = vmatprep.subr.bf16.mxu1 %v1960_v26 }
 0x627   :  { %1993 = vmatprep.subr.bf16.mxu0 %v1992_v30 }
 0x629   :  { %1963 = vmatpush3.bf16.msra.mxu1 %v1962_v36  ;;  %v1461_v36 = vld [vmem:[%s2463_s12] ss:$0 sm:$0xff] }
 0x62a   :  { %1995 = vmatpush3.bf16.msra.mxu0 %v1994_v37  ;;  %1965 = vmatprep.subr.bf16.mxu1 %v1964_v38 }
 0x62b   :  { %1997 = vmatprep.subr.bf16.mxu0 %v1996_v42 }
 0x62d   :  { %1967 = vmatpush3.bf16.msra.mxu1 %v1966_v51 }
 0x62e   :  { %1999 = vmatpush3.bf16.msra.mxu0 %v1998_v52  ;;  %1969 = vmatprep.subr.bf16.mxu1 %v1968_v53 }
 0x62f   :  { %2001 = vmatprep.subr.bf16.mxu0 %v2000_v59 }
 0x631   :  { %1971 = vmatpush3.bf16.msra.mxu1 %v1970_v63 }
 0x632   :  { %2003 = vmatpush3.bf16.msra.mxu0 %v2002_v1  ;;  %2004 = vmatprep.subr.bf16.mxu1 %v2068_v2 }
 0x634   :  { %1262 = vmatmul.mubr.f32.vlgmr.msra.gmra.mrb[4].mxu1 %v2376_v49  ;;  %v1341_v49 = vld [vmem:[%s2462_s11 + $0x18] sm:$0xff] }
 0x635   :  { %1332 = vmatmul.mubr.f32.vlgmr.msra.gmra.mrb[20].mxu0 %v2379_v50  ;;  %1819 = vmatprep.mubr.msk.f32.mxu1 %vm2066_vm0, %v2065_v0  ;;  %v2008_v50 = vpack.c.bf16 %v1341_v49, %v1340_v6  ;;  %v1342_v0 = vld [vmem:[%s2462_s11 + $0x20] sm:$0xff] }
 0x636   :  { %2006 = vmatpush3.bf16.msra.mxu1 %v2005_v43  ;;  %v2011_v7 = vpack.c.bf16 %v1343_v45, %v1342_v0 }
 0x637   :  { %2007 = vmatprep.subr.bf16.mxu1 %v2068_v2 }
 0x63a   :  { %2009 = vmatpush3.bf16.msra.mxu1 %v2008_v50 }
 0x63b   :  { %2010 = vmatprep.subr.bf16.mxu1 %v2068_v2 }
 0x63e   :  { %2012 = vmatpush3.bf16.msra.mxu1 %v2011_v7 }
 0x63f   :  { %2013 = vmatprep.subr.bf16.mxu1 %v2068_v2 }
 0x642   :  { %2015 = vmatpush3.bf16.msra.mxu1 %v2014_v10 }
 0x643   :  { %2016 = vmatprep.subr.bf16.mxu1 %v2068_v2 }
 0x646   :  { %2018 = vmatpush3.bf16.msra.mxu1 %v2017_v56 }
 0x647   :  { %2019 = vmatprep.subr.bf16.mxu1 %v2068_v2 }
 0x64a   :  { %2021 = vmatpush3.bf16.msra.mxu1 %v2020_v13 }
 0x64b   :  { %2022 = vmatprep.subr.bf16.mxu1 %v2068_v2 }
 0x64e   :  { %2024 = vmatpush3.bf16.msra.mxu1 %v2023_v16 }
 0x64f   :  { %2025 = vmatprep.subr.bf16.mxu1 %v2068_v2 }
 0x652   :  { %2027 = vmatpush3.bf16.msra.mxu1 %v2026_v18 }
 0x6e7   :  { %v1548_v19 = vpop.f32.mrb[2].mxu1 }
 0x6e8   :  { %v1549_v21 = vpop.f32.mrb[3].mxu1  ;;  %v1583_v22 = vpop.f32.mrb[18].mxu0 }
 0x6e9   :  { %v1550_v23 = vadd.f32 %v1549_v21, %v1548_v19  ;;  %v1584_v24 = vpop.f32.mrb[19].mxu0 }
 0x6ea   :  { %v1585_v2 = vadd.f32 %v1584_v24, %v1583_v22 }
 0x6eb   :  { %v1124_v25 = vadd.f32 %v1550_v23, %v1460_v20 }
 0x6ed   :  { %v1194_v26 = vadd.f32 %v1585_v2, %v1124_v25 }
 0x707   :  { %v1618_v27 = vpop.f32.mrb[4].mxu1 }
 0x708   :  { %v1619_v28 = vpop.f32.mrb[5].mxu1  ;;  %v1653_v29 = vpop.f32.mrb[20].mxu0 }
 0x709   :  { %v1620_v30 = vadd.f32 %v1619_v28, %v1618_v27  ;;  %v1654_v31 = vpop.f32.mrb[21].mxu0 }
 0x70a   :  { %v1655_v32 = vadd.f32 %v1654_v31, %v1653_v29 }
 0x70b   :  { %v1264_v33 = vadd.f32 %v1620_v30, %v1194_v26 }
 0x70d   :  { %v1334_v34 = vadd.f32 %v1655_v32, %v1264_v33 }
 0x70f   :  { %v1337_v35 = vmax.f32 %v1334_v34, 0.0 }
 0x711   :  { %1820 = vmatmul.mubr.f32.vlgmr.msra.gmra.mrb[6].mxu1 %v1337_v35 }
 0x7e4   :  { %v1427_v37 = vpop.f32.mrb[6].mxu1 }
 0x7e5   :  { %v1428_v38 = vadd.f32 %v1461_v36, %v1427_v37  ;;  %v1821_v39 = vpop.f32.mrb[7].mxu1 }
 0x7e7   :  { %1431 = vst [vmem:[%s2464_s13] sm:$0x3] %v1428_v38 }
 0x7e8   :  { %1436 = vsyncpa [#allocation3], 1 }

</bundles_post_ra>
